<compile_context>
chip_gen: v7x
topology: tpu7x:2x2x1
jax: 0.10.0
libtpu: 0.0.40
codegen_flags: <defaults>
</compile_context>

<pallas_src>
import functools

import jax
import jax.numpy as jnp
from jax import lax
from jax.experimental import pallas as pl
from jax.experimental.pallas import tpu as pltpu


def _round_up(x, m):
    return ((x + m - 1) // m) * m


def _dnn_kernel(
    ids_ref,       # (TB, L)      int32  token ids for this batch tile (VMEM)
    inv_len_ref,   # (TB, 1)      f32    1 / length for this batch tile
    emb_ref,       # (Vp, D)      f32    frozen embedding table, VMEM resident
    w1_ref,        # (D, Hp)      bf16   first linear weight (in, out), resident
    b1_ref,        # (1, Hp)      f32
    w2_ref,        # (Hp, Cp)     bf16   output linear weight (in, out), resident
    b2_ref,        # (1, Cp)      f32
    out_ref,       # (TB, Cp)     f32    logits for this batch tile
    *, vocab_pad,
):
    tb, seq_len = ids_ref.shape

    # ---- embedding sum as a token-count matmul (no gather, no DMAs) --------
    ids = ids_ref[...]                                             # (TB, L) int32
    vocab_iota = lax.broadcasted_iota(jnp.int32, (tb, vocab_pad), 1)

    counts = jnp.zeros((tb, vocab_pad), jnp.float32)
    # Static unroll over sequence positions: each step is one (TB, Vp) vreg
    # compare+add on the VPU.  seq_len is small here; for very long sequences
    # this would become a fori_loop over position chunks.
    for t in range(seq_len):
        counts = counts + (ids[:, t:t + 1] == vocab_iota).astype(jnp.float32)

    # counts @ table == sum of embedding rows per sample (exact in exact math;
    # f32 accumulation on the MXU keeps it ~1e-6 of the PyTorch f32 sum).
    rep_sum = jnp.dot(counts, emb_ref[...],
                      preferred_element_type=jnp.float32)          # (TB, D)

    # ---- mean -> Linear -> ReLU -> Linear (bf16 inputs, f32 accumulation) --
    rep = rep_sum * inv_len_ref[...]                               # multiply by 1/len

    h = jnp.dot(rep.astype(jnp.bfloat16), w1_ref[...],
                preferred_element_type=jnp.float32) + b1_ref[...]
    h = jnp.maximum(h, 0.0)                                        # ReLU

    logits = jnp.dot(h.astype(jnp.bfloat16), w2_ref[...],
                     preferred_element_type=jnp.float32) + b2_ref[...]
    out_ref[...] = logits.astype(out_ref.dtype)


def prep_lab_baseline_dnn(x_ids, lengths, emb_table, w1, b1, w2, b2,
                          *, tile_b=None):
    """Forward pass matching PrepLabBaselineDNN.forward.

    x_ids     : (B, L) int32 token ids
    lengths   : (B,)   int   sequence lengths
    emb_table : (V, D) f32   frozen embedding table
    w1 : (D, H), b1 : (H,), w2 : (H, C), b2 : (C,)   (weights in (in, out) layout)
    """
    B, L = x_ids.shape
    V, D = emb_table.shape
    H = w1.shape[1]
    C = w2.shape[1]

    # Lane-align hidden / output / vocab dims.  Zero padding is exact:
    # relu(0 + 0) = 0, padded w2 rows/cols are zero, padded vocab rows are
    # never matched by any id.
    H_pad = _round_up(H, 128)
    C_pad = _round_up(C, 128)
    V_pad = _round_up(V, 128)

    # Resident-table gate: keep the (double-buffered) f32 table well inside the
    # 32 MiB VMEM limit so the fast path is portable to v7x (64 MiB VMEM).
    # On v5e/v6e (128 MiB VMEM) both the gate and vmem_limit_bytes can be raised.
    table_bytes = V_pad * D * 4
    if table_bytes > 12 * 1024 * 1024:
        # TODO(synk): add a per-sample batched DMA-gather fallback (L row DMAs
        # into an (L, D) VMEM buffer, single wait, one sublane reduce) for
        # vocabularies too large to keep resident in VMEM.
        raise NotImplementedError(
            "Embedding table too large for the VMEM-resident fast path.")

    # Batch tile: multiple of 8 sublanes, capped at 128, and chosen so that a
    # large batch yields >= 2 grid tiles (so v7x's two TensorCores both work).
    if tile_b is None:
        tile_b = min(128, max(8, _round_up(pl.cdiv(B, 2), 8)))
    tile_b = _round_up(tile_b, 8)
    tile_b = min(tile_b, _round_up(B, 8))
    B_pad = _round_up(B, tile_b)

    # --- wrapper-side prep (cheap, O(B) / O(weights)) ------------------------
    ids_p = jnp.pad(x_ids.astype(jnp.int32), ((0, B_pad - B), (0, 0)))
    inv_len = 1.0 / lengths.astype(jnp.float32)            # reciprocal, not div
    inv_len = jnp.pad(inv_len, (0, B_pad - B), constant_values=1.0).reshape(B_pad, 1)

    emb_p = jnp.pad(emb_table.astype(jnp.float32), ((0, V_pad - V), (0, 0)))
    w1_p = jnp.pad(w1.astype(jnp.float32),
                   ((0, 0), (0, H_pad - H))).astype(jnp.bfloat16)
    b1_p = jnp.pad(b1.astype(jnp.float32), (0, H_pad - H)).reshape(1, H_pad)
    w2_p = jnp.pad(w2.astype(jnp.float32),
                   ((0, H_pad - H), (0, C_pad - C))).astype(jnp.bfloat16)
    b2_p = jnp.pad(b2.astype(jnp.float32), (0, C_pad - C)).reshape(1, C_pad)

    grid = (B_pad // tile_b,)
    kernel = functools.partial(_dnn_kernel, vocab_pad=V_pad)

    out = pl.pallas_call(
        kernel,
        out_shape=jax.ShapeDtypeStruct((B_pad, C_pad), jnp.float32),
        grid=grid,
        in_specs=[
            pl.BlockSpec((tile_b, L), lambda i: (i, 0)),     # ids (per-tile stream)
            pl.BlockSpec((tile_b, 1), lambda i: (i, 0)),     # 1 / length
            pl.BlockSpec((V_pad, D), lambda i: (0, 0)),      # emb table (resident)
            pl.BlockSpec((D, H_pad), lambda i: (0, 0)),      # w1 (resident)
            pl.BlockSpec((1, H_pad), lambda i: (0, 0)),      # b1 (resident)
            pl.BlockSpec((H_pad, C_pad), lambda i: (0, 0)),  # w2 (resident)
            pl.BlockSpec((1, C_pad), lambda i: (0, 0)),      # b2 (resident)
        ],
        out_specs=pl.BlockSpec((tile_b, C_pad), lambda i: (i, 0)),
        compiler_params=pltpu.CompilerParams(
            dimension_semantics=("parallel",),               # batch tiles independent
            vmem_limit_bytes=32 * 1024 * 1024,               # safe on v5e/v6e/v7x
        ),
    )(ids_p, inv_len, emb_p, w1_p, b1_p, w2_p, b2_p)

    return out[:B, :C]


if __name__ == "__main__":
    # Small, deterministic synthetic setup consistent with the module.
    B = 8          # batch
    L = 16         # max sequence length
    V = 100        # vocabulary size (num_embeddings)
    D = 64         # embedding dim
    H = 1000       # hidden size (hardcoded in the module: nn.Linear(dim, 1000))
    C = 4          # output_size (number of classes)

    key = jax.random.PRNGKey(0)
    k_emb, k_ids, k_len, k_w1, k_b1, k_w2, k_b2 = jax.random.split(key, 7)

    emb_table = jax.random.normal(k_emb, (V, D), dtype=jnp.float32) * 0.1
    x_ids = jax.random.randint(k_ids, (B, L), 0, V, dtype=jnp.int32)
    lengths = jax.random.randint(k_len, (B,), 1, L + 1, dtype=jnp.int32)

    # Deterministic PyTorch-style uniform init for the linear layers.
    bound1 = 1.0 / (D ** 0.5)
    w1 = jax.random.uniform(k_w1, (D, H), jnp.float32, -bound1, bound1)
    b1 = jax.random.uniform(k_b1, (H,), jnp.float32, -bound1, bound1)
    bound2 = 1.0 / (H ** 0.5)
    w2 = jax.random.uniform(k_w2, (H, C), jnp.float32, -bound2, bound2)
    b2 = jax.random.uniform(k_b2, (C,), jnp.float32, -bound2, bound2)

    logits = prep_lab_baseline_dnn(x_ids, lengths, emb_table, w1, b1, w2, b2)
    logits = jax.block_until_ready(logits)

    # Pure-JAX f32 reference (kernel uses bf16 linear weights + f32 accumulation,
    # hence the slightly relaxed tolerance).
    emb_ref = jnp.take(emb_table, x_ids, axis=0)
    rep_ref = jnp.sum(emb_ref, axis=1) / lengths.astype(jnp.float32)[:, None]
    h_ref = jnp.maximum(rep_ref @ w1 + b1, 0.0)
    logits_ref = h_ref @ w2 + b2

    assert logits.shape == (B, C)
    assert jnp.allclose(logits, logits_ref, atol=1e-2, rtol=1e-2), (
        float(jnp.max(jnp.abs(logits - logits_ref))))

    print("KERNEL_OK")
</pallas_src>

<mosaic_0001>
module attributes {stable_mosaic.version = 11 : i64} {
  func.func @_dnn_kernel(%arg0: i32, %arg1: memref<8x16xi32, #tpu.memory_space<vmem>>, %arg2: memref<8x1xf32, #tpu.memory_space<vmem>>, %arg3: memref<128x64xf32, #tpu.memory_space<vmem>>, %arg4: memref<64x1024xbf16, #tpu.memory_space<vmem>>, %arg5: memref<1x1024xf32, #tpu.memory_space<vmem>>, %arg6: memref<1024x128xbf16, #tpu.memory_space<vmem>>, %arg7: memref<1x128xf32, #tpu.memory_space<vmem>>, %arg8: memref<8x128xf32, #tpu.memory_space<vmem>>) attributes {dimension_semantics = [#tpu.dimension_semantics<parallel>], iteration_bounds = array<i64: 1>, scalar_prefetch = 0 : i64, scratch_operands = 0 : i64, tpu.core_type = #tpu.core_type<tc>, window_params = [{transform_indices = @transform_0, window_bounds = array<i64: 8, 16>}, {transform_indices = @transform_1, window_bounds = array<i64: 8, 1>}, {pipeline_mode = #tpu.pipeline_mode<synchronous>, transform_indices = @transform_2, window_bounds = array<i64: 128, 64>}, {pipeline_mode = #tpu.pipeline_mode<synchronous>, transform_indices = @transform_3, window_bounds = array<i64: 64, 1024>}, {pipeline_mode = #tpu.pipeline_mode<synchronous>, transform_indices = @transform_4, window_bounds = array<i64: 1, 1024>}, {pipeline_mode = #tpu.pipeline_mode<synchronous>, transform_indices = @transform_5, window_bounds = array<i64: 1024, 128>}, {pipeline_mode = #tpu.pipeline_mode<synchronous>, transform_indices = @transform_6, window_bounds = array<i64: 1, 128>}, {transform_indices = @transform_7, window_bounds = array<i64: 8, 128>}]} {
    %c0 = arith.constant 0 : index
    %c0_0 = arith.constant 0 : index
    %0 = vector.load %arg1[%c0, %c0_0] : memref<8x16xi32, #tpu.memory_space<vmem>>, vector<8x16xi32>
    %1 = tpu.iota {dimensions = array<i32: 1>} : vector<8x128xi32>
    %cst = arith.constant 0.000000e+00 : f32
    %2 = vector.broadcast %cst : f32 to vector<8x128xf32>
    %3 = vector.extract_strided_slice %0 {offsets = [0, 0], sizes = [8, 1], strides = [1, 1]} : vector<8x16xi32> to vector<8x1xi32>
    %4 = vector.broadcast %3 : vector<8x1xi32> to vector<8x128xi32>
    %5 = arith.cmpi eq, %4, %1 : vector<8x128xi32>
    %6 = arith.extui %5 : vector<8x128xi1> to vector<8x128xi32>
    %7 = arith.sitofp %6 : vector<8x128xi32> to vector<8x128xf32>
    %8 = arith.addf %2, %7 : vector<8x128xf32>
    %9 = vector.extract_strided_slice %0 {offsets = [0, 1], sizes = [8, 1], strides = [1, 1]} : vector<8x16xi32> to vector<8x1xi32>
    %10 = vector.broadcast %9 : vector<8x1xi32> to vector<8x128xi32>
    %11 = arith.cmpi eq, %10, %1 : vector<8x128xi32>
    %12 = arith.extui %11 : vector<8x128xi1> to vector<8x128xi32>
    %13 = arith.sitofp %12 : vector<8x128xi32> to vector<8x128xf32>
    %14 = arith.addf %8, %13 : vector<8x128xf32>
    %15 = vector.extract_strided_slice %0 {offsets = [0, 2], sizes = [8, 1], strides = [1, 1]} : vector<8x16xi32> to vector<8x1xi32>
    %16 = vector.broadcast %15 : vector<8x1xi32> to vector<8x128xi32>
    %17 = arith.cmpi eq, %16, %1 : vector<8x128xi32>
    %18 = arith.extui %17 : vector<8x128xi1> to vector<8x128xi32>
    %19 = arith.sitofp %18 : vector<8x128xi32> to vector<8x128xf32>
    %20 = arith.addf %14, %19 : vector<8x128xf32>
    %21 = vector.extract_strided_slice %0 {offsets = [0, 3], sizes = [8, 1], strides = [1, 1]} : vector<8x16xi32> to vector<8x1xi32>
    %22 = vector.broadcast %21 : vector<8x1xi32> to vector<8x128xi32>
    %23 = arith.cmpi eq, %22, %1 : vector<8x128xi32>
    %24 = arith.extui %23 : vector<8x128xi1> to vector<8x128xi32>
    %25 = arith.sitofp %24 : vector<8x128xi32> to vector<8x128xf32>
    %26 = arith.addf %20, %25 : vector<8x128xf32>
    %27 = vector.extract_strided_slice %0 {offsets = [0, 4], sizes = [8, 1], strides = [1, 1]} : vector<8x16xi32> to vector<8x1xi32>
    %28 = vector.broadcast %27 : vector<8x1xi32> to vector<8x128xi32>
    %29 = arith.cmpi eq, %28, %1 : vector<8x128xi32>
    %30 = arith.extui %29 : vector<8x128xi1> to vector<8x128xi32>
    %31 = arith.sitofp %30 : vector<8x128xi32> to vector<8x128xf32>
    %32 = arith.addf %26, %31 : vector<8x128xf32>
    %33 = vector.extract_strided_slice %0 {offsets = [0, 5], sizes = [8, 1], strides = [1, 1]} : vector<8x16xi32> to vector<8x1xi32>
    %34 = vector.broadcast %33 : vector<8x1xi32> to vector<8x128xi32>
    %35 = arith.cmpi eq, %34, %1 : vector<8x128xi32>
    %36 = arith.extui %35 : vector<8x128xi1> to vector<8x128xi32>
    %37 = arith.sitofp %36 : vector<8x128xi32> to vector<8x128xf32>
    %38 = arith.addf %32, %37 : vector<8x128xf32>
    %39 = vector.extract_strided_slice %0 {offsets = [0, 6], sizes = [8, 1], strides = [1, 1]} : vector<8x16xi32> to vector<8x1xi32>
    %40 = vector.broadcast %39 : vector<8x1xi32> to vector<8x128xi32>
    %41 = arith.cmpi eq, %40, %1 : vector<8x128xi32>
    %42 = arith.extui %41 : vector<8x128xi1> to vector<8x128xi32>
    %43 = arith.sitofp %42 : vector<8x128xi32> to vector<8x128xf32>
    %44 = arith.addf %38, %43 : vector<8x128xf32>
    %45 = vector.extract_strided_slice %0 {offsets = [0, 7], sizes = [8, 1], strides = [1, 1]} : vector<8x16xi32> to vector<8x1xi32>
    %46 = vector.broadcast %45 : vector<8x1xi32> to vector<8x128xi32>
    %47 = arith.cmpi eq, %46, %1 : vector<8x128xi32>
    %48 = arith.extui %47 : vector<8x128xi1> to vector<8x128xi32>
    %49 = arith.sitofp %48 : vector<8x128xi32> to vector<8x128xf32>
    %50 = arith.addf %44, %49 : vector<8x128xf32>
    %51 = vector.extract_strided_slice %0 {offsets = [0, 8], sizes = [8, 1], strides = [1, 1]} : vector<8x16xi32> to vector<8x1xi32>
    %52 = vector.broadcast %51 : vector<8x1xi32> to vector<8x128xi32>
    %53 = arith.cmpi eq, %52, %1 : vector<8x128xi32>
    %54 = arith.extui %53 : vector<8x128xi1> to vector<8x128xi32>
    %55 = arith.sitofp %54 : vector<8x128xi32> to vector<8x128xf32>
    %56 = arith.addf %50, %55 : vector<8x128xf32>
    %57 = vector.extract_strided_slice %0 {offsets = [0, 9], sizes = [8, 1], strides = [1, 1]} : vector<8x16xi32> to vector<8x1xi32>
    %58 = vector.broadcast %57 : vector<8x1xi32> to vector<8x128xi32>
    %59 = arith.cmpi eq, %58, %1 : vector<8x128xi32>
    %60 = arith.extui %59 : vector<8x128xi1> to vector<8x128xi32>
    %61 = arith.sitofp %60 : vector<8x128xi32> to vector<8x128xf32>
    %62 = arith.addf %56, %61 : vector<8x128xf32>
    %63 = vector.extract_strided_slice %0 {offsets = [0, 10], sizes = [8, 1], strides = [1, 1]} : vector<8x16xi32> to vector<8x1xi32>
    %64 = vector.broadcast %63 : vector<8x1xi32> to vector<8x128xi32>
    %65 = arith.cmpi eq, %64, %1 : vector<8x128xi32>
    %66 = arith.extui %65 : vector<8x128xi1> to vector<8x128xi32>
    %67 = arith.sitofp %66 : vector<8x128xi32> to vector<8x128xf32>
    %68 = arith.addf %62, %67 : vector<8x128xf32>
    %69 = vector.extract_strided_slice %0 {offsets = [0, 11], sizes = [8, 1], strides = [1, 1]} : vector<8x16xi32> to vector<8x1xi32>
    %70 = vector.broadcast %69 : vector<8x1xi32> to vector<8x128xi32>
    %71 = arith.cmpi eq, %70, %1 : vector<8x128xi32>
    %72 = arith.extui %71 : vector<8x128xi1> to vector<8x128xi32>
    %73 = arith.sitofp %72 : vector<8x128xi32> to vector<8x128xf32>
    %74 = arith.addf %68, %73 : vector<8x128xf32>
    %75 = vector.extract_strided_slice %0 {offsets = [0, 12], sizes = [8, 1], strides = [1, 1]} : vector<8x16xi32> to vector<8x1xi32>
    %76 = vector.broadcast %75 : vector<8x1xi32> to vector<8x128xi32>
    %77 = arith.cmpi eq, %76, %1 : vector<8x128xi32>
    %78 = arith.extui %77 : vector<8x128xi1> to vector<8x128xi32>
    %79 = arith.sitofp %78 : vector<8x128xi32> to vector<8x128xf32>
    %80 = arith.addf %74, %79 : vector<8x128xf32>
    %81 = vector.extract_strided_slice %0 {offsets = [0, 13], sizes = [8, 1], strides = [1, 1]} : vector<8x16xi32> to vector<8x1xi32>
    %82 = vector.broadcast %81 : vector<8x1xi32> to vector<8x128xi32>
    %83 = arith.cmpi eq, %82, %1 : vector<8x128xi32>
    %84 = arith.extui %83 : vector<8x128xi1> to vector<8x128xi32>
    %85 = arith.sitofp %84 : vector<8x128xi32> to vector<8x128xf32>
    %86 = arith.addf %80, %85 : vector<8x128xf32>
    %87 = vector.extract_strided_slice %0 {offsets = [0, 14], sizes = [8, 1], strides = [1, 1]} : vector<8x16xi32> to vector<8x1xi32>
    %88 = vector.broadcast %87 : vector<8x1xi32> to vector<8x128xi32>
    %89 = arith.cmpi eq, %88, %1 : vector<8x128xi32>
    %90 = arith.extui %89 : vector<8x128xi1> to vector<8x128xi32>
    %91 = arith.sitofp %90 : vector<8x128xi32> to vector<8x128xf32>
    %92 = arith.addf %86, %91 : vector<8x128xf32>
    %93 = vector.extract_strided_slice %0 {offsets = [0, 15], sizes = [8, 1], strides = [1, 1]} : vector<8x16xi32> to vector<8x1xi32>
    %94 = vector.broadcast %93 : vector<8x1xi32> to vector<8x128xi32>
    %95 = arith.cmpi eq, %94, %1 : vector<8x128xi32>
    %96 = arith.extui %95 : vector<8x128xi1> to vector<8x128xi32>
    %97 = arith.sitofp %96 : vector<8x128xi32> to vector<8x128xf32>
    %98 = arith.addf %92, %97 : vector<8x128xf32>
    %c0_1 = arith.constant 0 : index
    %c0_2 = arith.constant 0 : index
    %99 = vector.load %arg3[%c0_1, %c0_2] : memref<128x64xf32, #tpu.memory_space<vmem>>, vector<128x64xf32>
    %cst_3 = arith.constant dense<0.000000e+00> : vector<8x64xf32>
    %100 = tpu.matmul %98, %99, %cst_3 {dimension_numbers = #tpu.dot_dimension_numbers<[1], [0], [0], [1], [0, 0, 1, 1], [], []>} : vector<8x128xf32>, vector<128x64xf32>, vector<8x64xf32> -> vector<8x64xf32>
    %c0_4 = arith.constant 0 : index
    %c0_5 = arith.constant 0 : index
    %101 = vector.load %arg2[%c0_4, %c0_5] : memref<8x1xf32, #tpu.memory_space<vmem>>, vector<8x1xf32>
    %102 = vector.broadcast %101 : vector<8x1xf32> to vector<8x64xf32>
    %103 = arith.mulf %100, %102 : vector<8x64xf32>
    %104 = arith.truncf %103 : vector<8x64xf32> to vector<8x64xbf16>
    %c0_6 = arith.constant 0 : index
    %c0_7 = arith.constant 0 : index
    %105 = vector.load %arg4[%c0_6, %c0_7] : memref<64x1024xbf16, #tpu.memory_space<vmem>>, vector<64x1024xbf16>
    %cst_8 = arith.constant dense<0.000000e+00> : vector<8x1024xf32>
    %106 = tpu.matmul %104, %105, %cst_8 {dimension_numbers = #tpu.dot_dimension_numbers<[1], [0], [0], [1], [0, 0, 1, 1], [], []>} : vector<8x64xbf16>, vector<64x1024xbf16>, vector<8x1024xf32> -> vector<8x1024xf32>
    %c0_9 = arith.constant 0 : index
    %c0_10 = arith.constant 0 : index
    %107 = vector.load %arg5[%c0_9, %c0_10] : memref<1x1024xf32, #tpu.memory_space<vmem>>, vector<1x1024xf32>
    %108 = vector.broadcast %107 : vector<1x1024xf32> to vector<8x1024xf32>
    %109 = arith.addf %106, %108 : vector<8x1024xf32>
    %cst_11 = arith.constant 0.000000e+00 : f32
    %110 = vector.broadcast %cst_11 : f32 to vector<8x1024xf32>
    %111 = arith.maximumf %109, %110 : vector<8x1024xf32>
    %112 = arith.truncf %111 : vector<8x1024xf32> to vector<8x1024xbf16>
    %c0_12 = arith.constant 0 : index
    %c0_13 = arith.constant 0 : index
    %113 = vector.load %arg6[%c0_12, %c0_13] : memref<1024x128xbf16, #tpu.memory_space<vmem>>, vector<1024x128xbf16>
    %cst_14 = arith.constant dense<0.000000e+00> : vector<8x128xf32>
    %114 = tpu.matmul %112, %113, %cst_14 {dimension_numbers = #tpu.dot_dimension_numbers<[1], [0], [0], [1], [0, 0, 1, 1], [], []>} : vector<8x1024xbf16>, vector<1024x128xbf16>, vector<8x128xf32> -> vector<8x128xf32>
    %c0_15 = arith.constant 0 : index
    %c0_16 = arith.constant 0 : index
    %115 = vector.load %arg7[%c0_15, %c0_16] : memref<1x128xf32, #tpu.memory_space<vmem>>, vector<1x128xf32>
    %116 = vector.broadcast %115 : vector<1x128xf32> to vector<8x128xf32>
    %117 = arith.addf %114, %116 : vector<8x128xf32>
    %c0_17 = arith.constant 0 : index
    %c0_18 = arith.constant 0 : index
    %118 = vector.load %arg8[%c0_17, %c0_18] : memref<8x128xf32, #tpu.memory_space<vmem>>, vector<8x128xf32>
    tpu.vector_store %arg8[%c0_17, %c0_18], %117 {strides = array<i32>} : memref<8x128xf32, #tpu.memory_space<vmem>>, vector<8x128xf32>,
    return
  }
  func.func @transform_0(%arg0: i32) -> (i32, i32) {
    %c0_i32 = arith.constant 0 : i32
    %c0_i32_0 = arith.constant 0 : i32
    return %arg0, %c0_i32 : i32, i32
  }
  func.func @transform_1(%arg0: i32) -> (i32, i32) {
    %c0_i32 = arith.constant 0 : i32
    %c0_i32_0 = arith.constant 0 : i32
    return %arg0, %c0_i32 : i32, i32
  }
  func.func @transform_2(%arg0: i32) -> (i32, i32) {
    %c0_i32 = arith.constant 0 : i32
    %c0_i32_0 = arith.constant 0 : i32
    %c0_i32_1 = arith.constant 0 : i32
    return %c0_i32, %c0_i32_0 : i32, i32
  }
  func.func @transform_3(%arg0: i32) -> (i32, i32) {
    %c0_i32 = arith.constant 0 : i32
    %c0_i32_0 = arith.constant 0 : i32
    %c0_i32_1 = arith.constant 0 : i32
    return %c0_i32, %c0_i32_0 : i32, i32
  }
  func.func @transform_4(%arg0: i32) -> (i32, i32) {
    %c0_i32 = arith.constant 0 : i32
    %c0_i32_0 = arith.constant 0 : i32
    %c0_i32_1 = arith.constant 0 : i32
    return %c0_i32, %c0_i32_0 : i32, i32
  }
  func.func @transform_5(%arg0: i32) -> (i32, i32) {
    %c0_i32 = arith.constant 0 : i32
    %c0_i32_0 = arith.constant 0 : i32
    %c0_i32_1 = arith.constant 0 : i32
    return %c0_i32, %c0_i32_0 : i32, i32
  }
  func.func @transform_6(%arg0: i32) -> (i32, i32) {
    %c0_i32 = arith.constant 0 : i32
    %c0_i32_0 = arith.constant 0 : i32
    %c0_i32_1 = arith.constant 0 : i32
    return %c0_i32, %c0_i32_0 : i32, i32
  }
  func.func @transform_7(%arg0: i32) -> (i32, i32) {
    %c0_i32 = arith.constant 0 : i32
    %c0_i32_0 = arith.constant 0 : i32
    return %arg0, %c0_i32 : i32, i32
  }
}

</mosaic_0001>

<bundles_post_ra>
// kernel: tpu_custom_call.1
= control target key start
LH: loop header
LB: loop body
LE: loop exit
PB: predicated region body
PF: predicated region fallthrough
CT: control target
= control target key end

     0   :  { %12 = vsyncpa [#allocation3], 0  ;;  %s2116_s0 = inlined_call_operand.vmem [shape: s32[8,16], index: 0, kind: input, shape index: {}]   ;;  %s2117_s1 = inlined_call_operand.vmem [shape: f32[8,1], index: 1, kind: input, shape index: {}]   ;;  %s2118_s2 = inlined_call_operand.vmem [shape: f32[128,64], index: 2, kind: input, shape index: {}]   ;;  %s2119_s3 = inlined_call_operand.hbm [shape: bf16[64,1024], index: 3, kind: input, shape index: {}]   ;;  %s2120_s4 = inlined_call_operand.vmem [shape: f32[1,1024], index: 4, kind: input, shape index: {}]   ;;  %s2121_s5 = inlined_call_operand.hbm [shape: bf16[1024,128], index: 5, kind: input, shape index: {}]   ;;  %s2122_s6 = inlined_call_operand.vmem [shape: f32[1,128], index: 6, kind: input, shape index: {}]   ;;  %s2123_s7 = inlined_call_operand.hbm [shape: f32[8,128], index: 7, kind: output, shape index: {}]  }
   0x1   :  { %13 = vsyncpa [#allocation6], 0 }
   0x2   :  { %14 = vsyncpa [#allocation4], 0  ;;  %s1840_s24 = smov [#allocation2]   ;;  %s1768_s28 = scalar_lea.hbm %s2119_s3, 4096 }
   0x3   :  { %s26_s25 = sshll.u32 %s1840_s24, 4  ;;  %p1769_p0 = scmp.ne.s32.totalorder %s2119_s3, %s1768_s28  ;;  %s27_s25 = int_to_ptr.vmem [resolvable:$true] %s26_s25 }
   0x4   :  { %p1772_p1 = scmp.lt.u32.totalorder %s1768_s28, %s2119_s3 }
   0x6   :  { %p1774_p2 = pnand %p1772_p1, %p1769_p0 }
   0x8   :  { %1777 = shalt.err (!%p1774_p2)
}
   0x9   :  { %s1778_s10 = scalar_lea.vmem %s27_s25, 4096  ;;  %p1783_p4 = scmp.lt.s32.totalorder %s27_s25, %s27_s25 }
   0xa   :  { %p1779_p3 = scmp.ne.s32.totalorder %s27_s25, %s1778_s10  ;;  %p1784_p5 = scmp.lt.s32.totalorder %s1778_s10, %s1778_s10 }
   0xc   :  { %p1785_p6 = por %p1784_p5, %p1783_p4 }
   0xe   :  { %p1786_p7 = pnand %p1785_p6, %p1779_p3 }
  0x10   :  { %1789 = shalt.err (!%p1786_p7)
}
  0x11   :  { %s1841_s11 = smov 512   ;;  %s1842_s12 = smov 32  }
  0x12   :  { %32 = dma.hbm_to_vmem [thread:$0]  %s2119_s3, 4096, %s27_s25, [#allocation3], %s1841_s11, %s1841_s11, %s1842_s12  }
  0x13   :  { %s1843_s15 = smov [#allocation5]   ;;  %s1790_s19 = scalar_lea.hbm %s2121_s5, 8192 }
  0x14   :  { %s40_s16 = sshll.u32 %s1843_s15, 4  ;;  %p1791_p8 = scmp.ne.s32.totalorder %s2121_s5, %s1790_s19  ;;  %s41_s16 = int_to_ptr.vmem [resolvable:$true] %s40_s16 }
  0x15   :  { %p1794_p9 = scmp.lt.u32.totalorder %s1790_s19, %s2121_s5 }
  0x17   :  { %p1796_p10 = pnand %p1794_p9, %p1791_p8 }
  0x19   :  { %1799 = shalt.err (!%p1796_p10)
}
  0x1a   :  { %s1800_s24 = scalar_lea.vmem %s41_s16, 8192  ;;  %p1805_p12 = scmp.lt.s32.totalorder %s41_s16, %s41_s16 }
  0x1b   :  { %p1801_p11 = scmp.ne.s32.totalorder %s41_s16, %s1800_s24  ;;  %p1806_p13 = scmp.lt.s32.totalorder %s1800_s24, %s1800_s24 }
  0x1d   :  { %p1807_p0 = por %p1806_p13, %p1805_p12 }
  0x1f   :  { %p1808_p1 = pnand %p1807_p0, %p1801_p11 }
  0x21   :  { %1811 = shalt.err (!%p1808_p1)
}
  0x22   :  { %s1844_s3 = smov 64   ;;  %s1845_s25 = smov 4  }
  0x23   :  { %46 = dma.hbm_to_vmem [thread:$0]  %s2121_s5, 8192, %s41_s16, [#allocation6], %s1844_s3, %s1844_s3, %s1845_s25  }
  0x24   :  { %1834 = dma.done.wait [#allocation3], 4096  }
  0x25   :  { %1835 = vsyncadd [#allocation3], 4294963200 }
  0x26   :  { %1836 = dma.done.wait [#allocation6], 8192  }
  0x27   :  { %1837 = vsyncadd [#allocation6], 4294959104  ;;  %v1846_v0 = vmov 2   ;;  %v1847_v1 = vmov 0   ;;  %v1935_v2 = vld [vmem:[%s2116_s0] sm:$0xff]  ;;  %v1848_v3 = vmov 3   ;;  %v57_v63 = vlaneseq }
  0x28   :  { %1688 = vset.pattern.permute.xlu1 %v1846_v0  ;;  %1686 = vset.pattern.permute.xlu0 %v1847_v1  ;;  %v1849_v4 = vmov 1   ;;  %v1850_v5 = vmov 4   ;;  %v1851_v6 = vmov 5   ;;  %v1852_v7 = vmov 6   ;;  %v171_v9 = vld [vmem:[%s2118_s2] sm:$0xff]  ;;  %v172_v10 = vld [vmem:[%s2118_s2 + $0x8] sm:$0xff] }
  0x29   :  { %535 = vmatprep.mubr.bf16.mxu1 %v1847_v1  ;;  %74 = vperm.xlu1 %1688, %v1935_v2   ;;  %v1853_v8 = vmov 8   ;;  %v1637_v11 = vpack.c.bf16 %v172_v10, %v171_v9  ;;  %v1854_v12 = vmov 0.0|0.0   ;;  %v1855_v13 = vmov 7   ;;  %v173_v15 = vld [vmem:[%s2118_s2 + $0x10] sm:$0xff]  ;;  %v174_v16 = vld [vmem:[%s2118_s2 + $0x18] sm:$0xff]  ;;  %v175_v18 = vld [vmem:[%s2118_s2 + $0x20] sm:$0xff] }
  0x2a   :  { %60 = vperm.xlu0 %1686, %v1935_v2   ;;  %1636 = vmatprep.subr.bf16.mxu0 %v1854_v12  ;;  %v1856_v14 = vmov 11   ;;  %v1640_v17 = vpack.c.bf16 %v174_v16, %v173_v15  ;;  %v176_v19 = vld [vmem:[%s2118_s2 + $0x28] sm:$0xff]  ;;  %v1857_v20 = vmov 9   ;;  %v1858_v21 = vmov 14   ;;  %v177_v23 = vld [vmem:[%s2118_s2 + $0x30] sm:$0xff]  ;;  %v178_v24 = vld [vmem:[%s2118_s2 + $0x38] sm:$0xff] }
  0x2b   :  { %1638 = vmatpush3.bf16.msra.mxu0 %v1637_v11  ;;  %v1643_v22 = vpack.c.bf16 %v176_v19, %v175_v18  ;;  %v1646_v25 = vpack.c.bf16 %v178_v24, %v177_v23  ;;  %v1859_v26 = vmov 10   ;;  %v179_v27 = vld [vmem:[%s2118_s2 + $0x40] sm:$0xff]  ;;  %v180_v28 = vld [vmem:[%s2118_s2 + $0x48] sm:$0xff]  ;;  %v1860_v30 = vmov 12   ;;  %v181_v31 = vld [vmem:[%s2118_s2 + $0x50] sm:$0xff]  ;;  %s1865_s14 = smov [#allocation7]  }
  0x2c   :  { %1639 = vmatprep.subr.bf16.mxu0 %v1854_v12  ;;  %v1649_v29 = vpack.c.bf16 %v180_v28, %v179_v27  ;;  %v182_v32 = vld [vmem:[%s2118_s2 + $0x58] sm:$0xff]  ;;  %v1861_v34 = vmov 13   ;;  %v183_v35 = vld [vmem:[%s2118_s2 + $0x60] sm:$0xff]  ;;  %v184_v36 = vld [vmem:[%s2118_s2 + $0x68] sm:$0xff]  ;;  %v1862_v40 = vmov 15   ;;  %vm1863_vm0 = vmmov 0  }
  0x2d   :  { %1689 = vset.pattern.permute.xlu1 %v1848_v3  ;;  %v1652_v33 = vpack.c.bf16 %v182_v32, %v181_v31  ;;  %v1655_v37 = vpack.c.bf16 %v184_v36, %v183_v35  ;;  %v185_v38 = vld [vmem:[%s2118_s2 + $0x70] sm:$0xff]  ;;  %v186_v39 = vld [vmem:[%s2118_s2 + $0x78] sm:$0xff]  ;;  %v1864_v42 = vmov 0.0   ;;  %v257_v43 = vld [vmem:[%s2117_s1] sm:$0xff]  ;;  %v2022_v0 = vand.u32 127, %v57_v63  ;;  %s1369_s15 = sshll.u32 %s1865_s14, 4  ;;  %s1370_s15 = int_to_ptr.vmem [resolvable:$true] %s1369_s15 }
  0x2e   :  { %1687 = vset.pattern.permute.xlu0 %v1849_v4  ;;  %81 = vperm.xlu1 %1689, %v1935_v2   ;;  %v1658_v41 = vpack.c.bf16 %v186_v39, %v185_v38  ;;  %v265_v44 = vld [vmem:[#allocation2] sm:$0xff]  ;;  %v2007_v48 = vld [vmem:[#allocation2 + $0x10] sm:$0xff]  ;;  %p1817_p3 = scmp.lt.s32.totalorder %s1370_s15, %s1370_s15 }
  0x2f   :  { %67 = vperm.xlu0 %1687, %v1935_v2   ;;  %1641 = vmatpush3.bf16.msra.mxu0 %v1640_v17  ;;  %v269_v45 = vld [vmem:[#allocation2 + $0x20] sm:$0xff]  ;;  %v2009_v49 = vld [vmem:[#allocation2 + $0x30] sm:$0xff] }
  0x30   :  { %1642 = vmatprep.subr.bf16.mxu0 %v1854_v12  ;;  %1633 = vmatprep.mubr.msk.f32.mxu0 %vm1863_vm0, %v1864_v42  ;;  %v1396_v46 = vcombine.high %v265_v44, %v269_v45  ;;  %v1395_v47 = vcombine.low %v265_v44, %v269_v45  ;;  %v273_v50 = vld [vmem:[#allocation2 + $0x40] sm:$0xff]  ;;  %v1399_v51 = vcombine.low %v2007_v48, %v2009_v49 }
  0x31   :  { %v1400_v52 = vcombine.high %v2007_v48, %v2009_v49  ;;  %v277_v53 = vld [vmem:[#allocation2 + $0x60] sm:$0xff]  ;;  %v266_v48 = vld [vmem:[#allocation2 + $0x8] sm:$0xff] }
  0x32   :  { %1690 = vset.pattern.permute.xlu1 %v1850_v5  ;;  %503 = vmatprep.subr.bf16.mxu1 %v1396_v46  ;;  %v1404_v54 = vcombine.high %v273_v50, %v277_v53  ;;  %v1403_v55 = vcombine.low %v273_v50, %v277_v53  ;;  %v281_v56 = vld [vmem:[#allocation2 + $0x80] sm:$0xff]  ;;  %v275_v50 = vld [vmem:[#allocation2 + $0x50] sm:$0xff]  ;;  %v270_v49 = vld [vmem:[#allocation2 + $0x28] sm:$0xff] }
  0x33   :  { %1691 = vset.pattern.permute.xlu0 %v1851_v6  ;;  %88 = vperm.xlu1 %1690, %v1935_v2   ;;  %v285_v57 = vld [vmem:[#allocation2 + $0xa0] sm:$0xff] }
  0x34   :  { %95 = vperm.xlu0 %1691, %v1935_v2   ;;  %1644 = vmatpush3.bf16.msra.mxu0 %v1643_v22  ;;  %v1412_v58 = vcombine.high %v281_v56, %v285_v57  ;;  %v1411_v59 = vcombine.low %v281_v56, %v285_v57  ;;  %v2015_v60 = vld [vmem:[#allocation2 + $0xc0] sm:$0xff]  ;;  %v283_v56 = vld [vmem:[#allocation2 + $0x90] sm:$0xff] }
  0x35   :  { %1645 = vmatprep.subr.bf16.mxu0 %v1854_v12  ;;  %504 = vmatpush1.bf16.msra.mxu1 %v1395_v47  ;;  %v2017_v61 = vld [vmem:[#allocation2 + $0xe0] sm:$0xff]  ;;  %v287_v57 = vld [vmem:[#allocation2 + $0xb0] sm:$0xff] }
  0x36   :  { %505 = vmatprep.subr.bf16.mxu1 %v1404_v54  ;;  %v1420_v62 = vcombine.high %v2015_v60, %v2017_v61 }
  0x37   :  { %1692 = vset.pattern.permute.xlu1 %v1852_v7 }
  0x38   :  { %1694 = vset.pattern.permute.xlu0 %v1853_v8  ;;  %102 = vperm.xlu1 %1692, %v1935_v2  }
  0x39   :  { %116 = vperm.xlu0 %1694, %v1935_v2   ;;  %1647 = vmatpush3.bf16.msra.mxu0 %v1646_v25 }
  0x3a   :  { %1648 = vmatprep.subr.bf16.mxu0 %v1854_v12  ;;  %506 = vmatpush1.bf16.msra.mxu1 %v1403_v55 }
  0x3b   :  { %507 = vmatprep.subr.bf16.mxu1 %v1412_v58 }
  0x3c   :  { %1693 = vset.pattern.permute.xlu1 %v1855_v13 }
  0x3d   :  { %1697 = vset.pattern.permute.xlu0 %v1856_v14  ;;  %109 = vperm.xlu1 %1693, %v1935_v2  }
  0x3e   :  { %137 = vperm.xlu0 %1697, %v1935_v2   ;;  %1650 = vmatpush3.bf16.msra.mxu0 %v1649_v29 }
  0x3f   :  { %1651 = vmatprep.subr.bf16.mxu0 %v1854_v12  ;;  %508 = vmatpush1.bf16.msra.mxu1 %v1411_v59  ;;  %v1416_v59 = vcombine.high %v283_v56, %v287_v57 }
  0x40   :  { %509 = vmatprep.subr.bf16.mxu1 %v1420_v62  ;;  %v1415_v62 = vcombine.low %v283_v56, %v287_v57  ;;  %v1720_v56 = vld [vmem:[#allocation5 + $0xd0] sm:$0xff]  }
  0x41   :  { %1695 = vset.pattern.permute.xlu1 %v1857_v20  ;;  %v1721_v57 = vld [vmem:[#allocation5 + $0x70] sm:$0xff]  }
  0x42   :  { %1700 = vset.pattern.permute.xlu0 %v1858_v21  ;;  %123 = vperm.xlu1 %1695, %v1935_v2  }
  0x43   :  { %158 = vperm.xlu0 %1700, %v1935_v2   ;;  %1653 = vmatpush3.bf16.msra.mxu0 %v1652_v33 }
  0x44   :  { %1654 = vmatprep.subr.bf16.mxu0 %v1854_v12 }
  0x46   :  { %1696 = vset.pattern.permute.xlu1 %v1859_v26 }
  0x47   :  { %1703 = vset.pattern.permute.xlu0 %v1847_v1  ;;  %130 = vperm.xlu1 %1696, %v1935_v2  }
  0x48   :  { %1656 = vmatpush3.bf16.msra.mxu0 %v1655_v37 }
  0x49   :  { %1657 = vmatprep.subr.bf16.mxu0 %v1854_v12 }
  0x4b   :  { %1698 = vset.pattern.permute.xlu1 %v1860_v30 }
  0x4c   :  { %144 = vperm.xlu1 %1698, %v1935_v2   ;;  %1659 = vmatpush3.bf16.msra.mxu0 %v1658_v41 }
  0x4d   :  { %585 = vmatprep.subr.bf16.mxu0 %v1400_v52  ;;  %v279_v52 = vld [vmem:[#allocation2 + $0x70] sm:$0xff] }
  0x4e   :  { %v1408_v55 = vcombine.high %v275_v50, %v279_v52  ;;  %v1407_v58 = vcombine.low %v275_v50, %v279_v52 }
  0x50   :  { %1699 = vset.pattern.permute.xlu1 %v1861_v34 }
  0x51   :  { %151 = vperm.xlu1 %1699, %v1935_v2  }
  0x55   :  { %1701 = vset.pattern.permute.xlu1 %v1862_v40 }
  0x56   :  { %165 = vperm.xlu1 %1701, %v1935_v2  }
  0x5a   :  { %1702 = vset.pattern.permute.xlu1 %v1847_v1 }
  0x5b   :  { %260 = vperm.xlu1 %1702, %v257_v43  }
  0xa8   :  { %v75_v2 = vpop.permute.xlu1 %74 }
  0xa9   :  { %v61_v3 = vpop.permute.xlu0 %60  ;;  %vm76_vm2 = vcmp.eq.s32.totalorder %v75_v2, %v2022_v0  ;;  %v1419_v2 = vcombine.low %v2015_v60, %v2017_v61 }
  0xaa   :  { %vm62_vm1 = vcmp.eq.s32.totalorder %v61_v3, %v2022_v0  ;;  %v1381_v9 = vsel %vm76_vm2, 1.0, %v1864_v42 }
  0xab   :  { %v1379_v4 = vsel %vm62_vm1, 1.0, %v1864_v42  ;;  %510 = vmatpush1.bf16.msra.mxu1 %v1419_v2  ;;  %vm499_vm1 = vcmask 523264   ;;  %v1727_v2 = vld [vmem:[#allocation5 + $0x38] sm:$0xff]  }
  0xad   :  { %v82_v5 = vpop.permute.xlu1 %81 }
  0xae   :  { %v68_v6 = vpop.permute.xlu0 %67  ;;  %vm83_vm4 = vcmp.eq.s32.totalorder %v82_v5, %v2022_v0  ;;  %v1397_v5 = vcombine.low %v266_v48, %v270_v49 }
  0xaf   :  { %vm69_vm3 = vcmp.eq.s32.totalorder %v68_v6, %v2022_v0  ;;  %v1382_v13 = vsel %vm83_vm4, 1.0, %v1864_v42  ;;  %v1704_v6 = vld [vmem:[#allocation5 + $0x40] sm:$0xff]  }
  0xb0   :  { %v1380_v7 = vsel %vm69_vm3, 1.0, %v1864_v42 }
  0xb1   :  { %v72_v8 = vadd.f32 %v1380_v7, %v1379_v4 }
  0xb2   :  { %v89_v11 = vpop.permute.xlu1 %88 }
  0xb3   :  { %v79_v10 = vadd.f32 %v1381_v9, %v72_v8  ;;  %v96_v12 = vpop.permute.xlu0 %95  ;;  %vm90_vm5 = vcmp.eq.s32.totalorder %v89_v11, %v2022_v0  ;;  %v274_v9 = vld [vmem:[#allocation2 + $0x48] sm:$0xff] }
  0xb4   :  { %vm97_vm6 = vcmp.eq.s32.totalorder %v96_v12, %v2022_v0  ;;  %v1383_v15 = vsel %vm90_vm5, 1.0, %v1864_v42 }
  0xb5   :  { %v86_v14 = vadd.f32 %v1382_v13, %v79_v10  ;;  %v1384_v17 = vsel %vm97_vm6, 1.0, %v1864_v42  ;;  %v278_v10 = vld [vmem:[#allocation2 + $0x68] sm:$0xff]  ;;  %v1705_v13 = vld [vmem:[#allocation5] sm:$0xff]  }
  0xb6   :  { %v1406_v61 = vcombine.high %v274_v9, %v278_v10 }
  0xb7   :  { %v93_v16 = vadd.f32 %v1383_v15, %v86_v14  ;;  %v103_v18 = vpop.permute.xlu1 %102  ;;  %v282_v14 = vld [vmem:[#allocation2 + $0x88] sm:$0xff] }
  0xb8   :  { %vm104_vm7 = vcmp.eq.s32.totalorder %v103_v18, %v2022_v0  ;;  %v117_v21 = vpop.permute.xlu0 %116  ;;  %v286_v15 = vld [vmem:[#allocation2 + $0xa8] sm:$0xff] }
  0xb9   :  { %v100_v19 = vadd.f32 %v1384_v17, %v93_v16  ;;  %v1385_v20 = vsel %vm104_vm7, 1.0, %v1864_v42  ;;  %vm118_vm9 = vcmp.eq.s32.totalorder %v117_v21, %v2022_v0  ;;  %v1706_v16 = vld [vmem:[#allocation5 + $0x48] sm:$0xff]   ;;  %v1405_v17 = vcombine.low %v274_v9, %v278_v10  ;;  %v1744_v9 = vld [vmem:[#allocation5 + $0x1c0] sm:$0xff]  }
  0xba   :  { %v1387_v26 = vsel %vm118_vm9, 1.0, %v1864_v42  ;;  %v1414_v18 = vcombine.high %v282_v14, %v286_v15  ;;  %v294_v21 = vld [vmem:[#allocation2 + $0xe8] sm:$0xff]  ;;  %v2075_v10 = vshrl.u32 %v57_v63, 7 }
  0xbb   :  { %v107_v23 = vadd.f32 %v1385_v20, %v100_v19  ;;  %v1707_v19 = vld [vmem:[#allocation5 + $0x8] sm:$0xff]  }
  0xbc   :  { %v110_v22 = vpop.permute.xlu1 %109  ;;  %v290_v20 = vld [vmem:[#allocation2 + $0xc8] sm:$0xff] }
  0xbd   :  { %vm111_vm8 = vcmp.eq.s32.totalorder %v110_v22, %v2022_v0  ;;  %v138_v30 = vpop.permute.xlu0 %137  ;;  %v1708_v22 = vld [vmem:[#allocation5 + $0x50] sm:$0xff]  }
  0xbe   :  { %v1386_v24 = vsel %vm111_vm8, 1.0, %v1864_v42  ;;  %vm139_vm12 = vcmp.eq.s32.totalorder %v138_v30, %v2022_v0 }
  0xbf   :  { %v114_v25 = vadd.f32 %v1386_v24, %v107_v23  ;;  %v1390_v35 = vsel %vm139_vm12, 1.0, %v1864_v42  ;;  %v1413_v23 = vcombine.low %v282_v14, %v286_v15  ;;  %v1422_v24 = vcombine.high %v290_v20, %v294_v21 }
  0xc1   :  { %v124_v27 = vpop.permute.xlu1 %123  ;;  %v121_v28 = vadd.f32 %v1387_v26, %v114_v25  ;;  %v1709_v25 = vld [vmem:[#allocation5 + $0x10] sm:$0xff]   ;;  %v268_v26 = vld [vmem:[#allocation2 + $0x18] sm:$0xff] }
  0xc2   :  { %vm125_vm10 = vcmp.eq.s32.totalorder %v124_v27, %v2022_v0  ;;  %v159_v37 = vpop.permute.xlu0 %158  ;;  %v272_v27 = vld [vmem:[#allocation2 + $0x38] sm:$0xff] }
  0xc3   :  { %v1388_v29 = vsel %vm125_vm10, 1.0, %v1864_v42  ;;  %vm160_vm14 = vcmp.eq.s32.totalorder %v159_v37, %v2022_v0  ;;  %v1402_v30 = vcombine.high %v268_v26, %v272_v27  ;;  %v1715_v37 = vld [vmem:[#allocation5 + $0x20] sm:$0xff]  }
  0xc4   :  { %v128_v32 = vadd.f32 %v1388_v29, %v121_v28  ;;  %v1393_v44 = vsel %vm160_vm14, 1.0, %v1864_v42  ;;  %v1710_v28 = vld [vmem:[#allocation5 + $0x58] sm:$0xff]   ;;  %v1421_v29 = vcombine.low %v290_v20, %v294_v21 }
  0xc6   :  { %v131_v31 = vpop.permute.xlu1 %130 }
  0xc7   :  { %vm132_vm11 = vcmp.eq.s32.totalorder %v131_v31, %v2022_v0  ;;  %v1711_v31 = vld [vmem:[#allocation5 + $0x18] sm:$0xff]  }
  0xc8   :  { %v1389_v33 = vsel %vm132_vm11, 1.0, %v1864_v42 }
  0xc9   :  { %v135_v34 = vadd.f32 %v1389_v33, %v128_v32  ;;  %v276_v32 = vld [vmem:[#allocation2 + $0x58] sm:$0xff] }
  0xca   :  { %v280_v33 = vld [vmem:[#allocation2 + $0x78] sm:$0xff] }
  0xcb   :  { %v145_v36 = vpop.permute.xlu1 %144  ;;  %v142_v38 = vadd.f32 %v1390_v35, %v135_v34  ;;  %v1713_v34 = vld [vmem:[#allocation5 + $0x60] sm:$0xff]   ;;  %v1401_v35 = vcombine.low %v268_v26, %v272_v27 }
  0xcc   :  { %vm146_vm13 = vcmp.eq.s32.totalorder %v145_v36, %v2022_v0  ;;  %v1410_v36 = vcombine.high %v276_v32, %v280_v33 }
  0xcd   :  { %v1391_v39 = vsel %vm146_vm13, 1.0, %v1864_v42 }
  0xce   :  { %v149_v41 = vadd.f32 %v1391_v39, %v142_v38  ;;  %v284_v38 = vld [vmem:[#allocation2 + $0x98] sm:$0xff] }
  0xcf   :  { %v288_v39 = vld [vmem:[#allocation2 + $0xb8] sm:$0xff] }
  0xd0   :  { %v152_v40 = vpop.permute.xlu1 %151 }
  0xd1   :  { %vm153_vm15 = vcmp.eq.s32.totalorder %v152_v40, %v2022_v0  ;;  %v1717_v40 = vld [vmem:[#allocation5 + $0x68] sm:$0xff]  }
  0xd2   :  { %v1392_v43 = vsel %vm153_vm15, 1.0, %v1864_v42 }
  0xd3   :  { %v156_v45 = vadd.f32 %v1392_v43, %v149_v41  ;;  %v1409_v41 = vcombine.low %v276_v32, %v280_v33  ;;  %v1418_v43 = vcombine.high %v284_v38, %v288_v39  ;;  %v1734_v32 = vld [vmem:[#allocation5 + $0x148] sm:$0xff]  }
  0xd5   :  { %v163_v46 = vadd.f32 %v1393_v44, %v156_v45  ;;  %v166_v47 = vpop.permute.xlu1 %165  ;;  %v1719_v44 = vld [vmem:[#allocation5 + $0x28] sm:$0xff]   ;;  %v292_v45 = vld [vmem:[#allocation2 + $0xd8] sm:$0xff] }
  0xd6   :  { %vm167_vm0 = vcmp.eq.s32.totalorder %v166_v47, %v2022_v0  ;;  %v291_v0 = vld [vmem:[#allocation2 + $0xd0] sm:$0xff]  ;;  %v1417_v47 = vcombine.low %v284_v38, %v288_v39 }
  0xd7   :  { %v1394_v53 = vsel %vm167_vm0, 1.0, %v1864_v42  ;;  %v295_v42 = vld [vmem:[#allocation2 + $0xf0] sm:$0xff] }
  0xd8   :  { %v170_v54 = vadd.f32 %v1394_v53, %v163_v46  ;;  %v1424_v3 = vcombine.high %v291_v0, %v295_v42  ;;  %v1423_v4 = vcombine.low %v291_v0, %v295_v42  ;;  %v296_v46 = vld [vmem:[#allocation2 + $0xf8] sm:$0xff]  ;;  %v1712_v53 = vld [vmem:[#allocation5 + $0xc0] sm:$0xff]  }
  0xd9   :  { %v1426_v50 = vcombine.high %v292_v45, %v296_v46  ;;  %v1425_v52 = vcombine.low %v292_v45, %v296_v46  ;;  %v1725_v0 = vld [vmem:[#allocation5 + $0x78] sm:$0xff]  }
  0xda   :  { %1634 = vmatmul.mubr.f32.vlgmr.msra.gmra.mrb[0].mxu0 %v170_v54  ;;  %v261_v7 = vpop.permute.xlu1 %260  ;;  %v1714_v54 = vld [vmem:[#allocation5 + $0x80] sm:$0xff]   ;;  %v1726_v42 = vld [vmem:[#allocation5 + $0x98] sm:$0xff]  }
  0xdb   :  { %586 = vmatpush1.bf16.msra.mxu0 %v1399_v51  ;;  %617 = vmatprep.mubr.bf16.mxu0 %v1847_v1  ;;  %v1398_v51 = vcombine.high %v266_v48, %v270_v49  ;;  %v1730_v48 = vld [vmem:[#allocation5 + $0x140] sm:$0xff]   ;;  %v1732_v49 = vld [vmem:[#allocation5 + $0xe8] sm:$0xff]  }
  0xdc   :  { %587 = vmatprep.subr.bf16.mxu0 %v1408_v55  ;;  %v1718_v55 = vld [vmem:[#allocation5 + $0x88] sm:$0xff]  }
  0xdd   :  { %544 = vmatprep.subr.bf16.mxu1 %v1398_v51  ;;  %v1733_v51 = vld [vmem:[#allocation5 + $0xa8] sm:$0xff]  }
  0xdf   :  { %588 = vmatpush1.bf16.msra.mxu0 %v1407_v58  ;;  %v1722_v58 = vld [vmem:[#allocation5 + $0x90] sm:$0xff]  }
  0xe0   :  { %589 = vmatprep.subr.bf16.mxu0 %v1416_v59  ;;  %v1723_v59 = vld [vmem:[#allocation5 + $0x30] sm:$0xff]  }
  0xe3   :  { %590 = vmatpush1.bf16.msra.mxu0 %v1415_v62  ;;  %v1724_v62 = vld [vmem:[#allocation5 + $0xd8] sm:$0xff]  }
  0xe4   :  { %591 = vmatprep.subr.bf16.mxu0 %v1424_v3  ;;  %v1728_v3 = vld [vmem:[#allocation5 + $0xe0] sm:$0xff]  }
  0xe7   :  { %592 = vmatpush1.bf16.msra.mxu0 %v1423_v4  ;;  %v1729_v4 = vld [vmem:[#allocation5 + $0xa0] sm:$0xff]  }
  0xe8   :  { %1513 = vmatprep.subr.bf16.mxu0 %v1704_v6  ;;  %v1737_v6 = vld [vmem:[#allocation5 + $0xb0] sm:$0xff]  }
 0x1ad   :  { %v253_v8 = vpop.f32.mrb[0].mxu0 }
 0x1ae   :  { %v263_v11 = vmul.f32 %v261_v7, %v253_v8  ;;  %v1635_v12 = vpop.f32.mrb[1].mxu0  ;;  %v1740_v7 = vld [vmem:[#allocation5 + $0xf8] sm:$0xff]  }
 0x1af   :  { %v1741_v8 = vld [vmem:[#allocation5 + $0xb8] sm:$0xff]   ;;  %v2081_v12 = vld [vmem:[%s2120_s4] sm:$0xff] }
 0x1b0   :  { %v2062_v60 = vpack.c.bf16 %v263_v11, %v263_v11  ;;  %v301_v11 = vsub.s32 0, %v2075_v10 }
 0x1b2   :  { %1427 = vmatmul.mubr.msk.bf16.vlgmr.msra.gmra.mrb[0].mxu1 %vm499_vm1, %v2062_v60  ;;  %1429 = vmatmul.mubr.msk.bf16.vlgmr.msra.gmra.mrb[4].mxu0 %vm499_vm1, %v2062_v60 }
 0x1b3   :  { %545 = vmatpush1.bf16.msra.mxu1 %v1397_v5  ;;  %576 = vmatprep.mubr.bf16.mxu1 %v1847_v1  ;;  %v1736_v5 = vld [vmem:[#allocation5 + $0xf0] sm:$0xff]  }
 0x1b4   :  { %546 = vmatprep.subr.bf16.mxu1 %v1406_v61  ;;  %1514 = vmatpush3.bf16.msra.mxu0 %v1705_v13  ;;  %v321_v61 = vsub.s32 5, %v2075_v10  ;;  %v302_v13 = vrot.slane %v2081_v12, %v301_v11 }
 0x1b5   :  { %1515 = vmatprep.subr.bf16.mxu0 %v1706_v16 }
 0x1b6   :  { %v322_v15 = vrot.slane %v2081_v12, %v321_v61 }
 0x1b7   :  { %547 = vmatpush1.bf16.msra.mxu1 %v1405_v17 }
 0x1b8   :  { %548 = vmatprep.subr.bf16.mxu1 %v1414_v18  ;;  %1516 = vmatpush3.bf16.msra.mxu0 %v1707_v19 }
 0x1b9   :  { %1517 = vmatprep.subr.bf16.mxu0 %v1708_v22 }
 0x1bb   :  { %549 = vmatpush1.bf16.msra.mxu1 %v1413_v23 }
 0x1bc   :  { %550 = vmatprep.subr.bf16.mxu1 %v1422_v24  ;;  %1518 = vmatpush3.bf16.msra.mxu0 %v1709_v25 }
 0x1bd   :  { %1519 = vmatprep.subr.bf16.mxu0 %v1710_v28 }
 0x1bf   :  { %551 = vmatpush1.bf16.msra.mxu1 %v1421_v29 }
 0x1c0   :  { %626 = vmatprep.subr.bf16.mxu1 %v1402_v30  ;;  %1520 = vmatpush3.bf16.msra.mxu0 %v1711_v31  ;;  %v1731_v30 = vld [vmem:[#allocation5 + $0x100] sm:$0xff]  }
 0x1c1   :  { %1521 = vmatprep.subr.bf16.mxu0 %v1713_v34  ;;  %v309_v34 = vsub.s32 2, %v2075_v10 }
 0x1c2   :  { %1428 = vmatmul.mubr.msk.bf16.vlgmr.msra.gmra.mrb[4].mxu1 %vm499_vm1, %v2062_v60 }
 0x1c3   :  { %627 = vmatpush1.bf16.msra.mxu1 %v1401_v35  ;;  %658 = vmatprep.mubr.bf16.mxu1 %v1847_v1  ;;  %v1716_v1 = vld [vmem:[#allocation5 + $0xc8] sm:$0xff]   ;;  %v310_v38 = vrot.slane %v2081_v12, %v309_v34 }
 0x1c4   :  { %628 = vmatprep.subr.bf16.mxu1 %v1410_v36  ;;  %1522 = vmatpush3.bf16.msra.mxu0 %v1715_v37  ;;  %v1735_v35 = vld [vmem:[#allocation5 + $0x108] sm:$0xff]   ;;  %v313_v36 = vsub.s32 3, %v2075_v10  ;;  %v1738_v37 = vld [vmem:[#allocation5 + $0x150] sm:$0xff]  }
 0x1c5   :  { %1523 = vmatprep.subr.bf16.mxu0 %v1717_v40  ;;  %v1739_v40 = vld [vmem:[#allocation5 + $0x110] sm:$0xff]  }
 0x1c6   :  { %v314_v39 = vrot.slane %v2081_v12, %v313_v36 }
 0x1c7   :  { %629 = vmatpush1.bf16.msra.mxu1 %v1409_v41  ;;  %v1742_v41 = vld [vmem:[#allocation5 + $0x158] sm:$0xff]  }
 0x1c8   :  { %630 = vmatprep.subr.bf16.mxu1 %v1418_v43  ;;  %1524 = vmatpush3.bf16.msra.mxu0 %v1719_v44 }
 0x1c9   :  { %1525 = vmatprep.subr.bf16.mxu0 %v1721_v57  ;;  %v1747_v57 = vld [vmem:[#allocation5 + $0x120] sm:$0xff]  }
 0x1cb   :  { %631 = vmatpush1.bf16.msra.mxu1 %v1417_v47 }
 0x1cc   :  { %632 = vmatprep.subr.bf16.mxu1 %v1426_v50  ;;  %1526 = vmatpush3.bf16.msra.mxu0 %v1723_v59  ;;  %v1743_v50 = vld [vmem:[#allocation5 + $0x118] sm:$0xff]  }
 0x1cd   :  { %1527 = vmatprep.subr.bf16.mxu0 %v1725_v0  ;;  %v1749_v0 = vld [vmem:[#allocation5 + $0x168] sm:$0xff]  }
 0x1cf   :  { %633 = vmatpush1.bf16.msra.mxu1 %v1425_v52 }
 0x1d0   :  { %1535 = vmatprep.subr.bf16.mxu1 %v1712_v53  ;;  %1528 = vmatpush3.bf16.msra.mxu0 %v1727_v2  ;;  %v1751_v2 = vld [vmem:[#allocation5 + $0x128] sm:$0xff]  }
 0x1d1   :  { %1557 = vmatprep.subr.bf16.mxu0 %v1730_v48  ;;  %v1752_v48 = vld [vmem:[#allocation5 + $0x1d0] sm:$0xff]  }
 0x1d2   :  { %1430 = vmatmul.mubr.msk.bf16.vlgmr.msra.gmra.mrb[8].mxu1 %vm499_vm1, %v2062_v60  ;;  %v305_v60 = vsub.s32 1, %v2075_v10 }
 0x1d3   :  { %1536 = vmatpush3.bf16.msra.mxu1 %v1714_v54  ;;  %v1745_v54 = vld [vmem:[#allocation5 + $0x160] sm:$0xff]  }
 0x1d4   :  { %1537 = vmatprep.subr.bf16.mxu1 %v1716_v1  ;;  %v306_v14 = vrot.slane %v2081_v12, %v305_v60 }
 0x1d7   :  { %1538 = vmatpush3.bf16.msra.mxu1 %v1718_v55 }
 0x1d8   :  { %1539 = vmatprep.subr.bf16.mxu1 %v1720_v56  ;;  %v1746_v56 = vld [vmem:[#allocation5 + $0x180] sm:$0xff]  }
 0x1db   :  { %1540 = vmatpush3.bf16.msra.mxu1 %v1722_v58  ;;  %v317_v58 = vsub.s32 4, %v2075_v10 }
 0x1dc   :  { %1541 = vmatprep.subr.bf16.mxu1 %v1724_v62  ;;  %v1748_v62 = vld [vmem:[#allocation5 + $0x1c8] sm:$0xff]  }
 0x1df   :  { %1542 = vmatpush3.bf16.msra.mxu1 %v1726_v42  ;;  %v1750_v42 = vld [vmem:[#allocation5 + $0x188] sm:$0xff]  }
 0x1e0   :  { %1543 = vmatprep.subr.bf16.mxu1 %v1728_v3  ;;  %v329_v3 = vsub.s32 7, %v2075_v10 }
 0x1e3   :  { %1544 = vmatpush3.bf16.msra.mxu1 %v1729_v4  ;;  %v318_v4 = vrot.slane %v2081_v12, %v317_v58 }
 0x1e4   :  { %1545 = vmatprep.subr.bf16.mxu1 %v1732_v49  ;;  %v1753_v49 = vld [vmem:[#allocation5 + $0x170] sm:$0xff]  }
 0x1e7   :  { %1546 = vmatpush3.bf16.msra.mxu1 %v1733_v51  ;;  %v330_v51 = vrot.slane %v2081_v12, %v329_v3 }
 0x1e8   :  { %1547 = vmatprep.subr.bf16.mxu1 %v1736_v5  ;;  %v1754_v5 = vld [vmem:[#allocation5 + $0x190] sm:$0xff]  }
 0x1eb   :  { %1548 = vmatpush3.bf16.msra.mxu1 %v1737_v6  ;;  %v1755_v6 = vld [vmem:[#allocation5 + $0x130] sm:$0xff]  }
 0x1ec   :  { %1549 = vmatprep.subr.bf16.mxu1 %v1740_v7 }
 0x1ef   :  { %1550 = vmatpush3.bf16.msra.mxu1 %v1741_v8  ;;  %v1756_v8 = vld [vmem:[#allocation5 + $0x1d8] sm:$0xff]  }
 0x1f0   :  { %1579 = vmatprep.subr.bf16.mxu1 %v1744_v9  ;;  %v1757_v9 = vld [vmem:[#allocation5 + $0x178] sm:$0xff]  }
 0x285   :  { %v537_v16 = vpop.f32.mrb[0].mxu1  ;;  %v2088_v63 = vpop.f32.mrb[4].mxu0 }
 0x286   :  { %v538_v17 = vadd.f32 %v537_v16, %v302_v13  ;;  %v539_v18 = vpop.f32.mrb[1].mxu1  ;;  %v621_v19 = vpop.f32.mrb[5].mxu0  ;;  %v620_v7 = vadd.f32 %v2088_v63, %v318_v4  ;;  %v1761_v63 = vld [vmem:[#allocation5 + $0x1a0] sm:$0xff]  }
 0x287   :  { %v540_v20 = vadd.f32 %v539_v18, %v306_v14  ;;  %v622_v21 = vadd.f32 %v621_v19, %v322_v15  ;;  %v541_v22 = vpop.f32.mrb[2].mxu1  ;;  %v623_v23 = vpop.f32.mrb[6].mxu0  ;;  %v1758_v14 = vld [vmem:[#allocation5 + $0x198] sm:$0xff]   ;;  %v1760_v18 = vld [vmem:[#allocation5 + $0x1e0] sm:$0xff]  }
 0x288   :  { %v667_v24 = vmax.f32 %v538_v17, 0.0  ;;  %v542_v25 = vpop.f32.mrb[3].mxu1  ;;  %v624_v26 = vpop.f32.mrb[7].mxu0  ;;  %v1759_v15 = vld [vmem:[#allocation5 + $0x138] sm:$0xff]   ;;  %v671_v16 = vmax.f32 %v620_v7, 0.0  ;;  %v325_v22 = vsub.s32 6, %v2075_v10 }
 0x289   :  { %v668_v27 = vmax.f32 %v540_v20, 0.0  ;;  %v672_v28 = vmax.f32 %v622_v21, 0.0  ;;  %v1762_v23 = vld [vmem:[#allocation5 + $0x1e8] sm:$0xff]   ;;  %v1764_v26 = vld [vmem:[#allocation5 + $0x1f0] sm:$0xff]  }
 0x28a   :  { %v675_v31 = vpack.c.bf16 %v667_v24, %v667_v24  ;;  %v679_v21 = vpack.c.bf16 %v671_v16, %v671_v16  ;;  %v1763_v24 = vld [vmem:[#allocation5 + $0x1a8] sm:$0xff]   ;;  %v326_v25 = vrot.slane %v2081_v12, %v325_v22  ;;  %v1431_v12 = vld [vmem:[%s2122_s6] ss:$0 sm:$0xff]  ;;  %s1812_s6 = scalar_lea.vmem %s1370_s15, 128 }
 0x28b   :  { %v676_v29 = vpack.c.bf16 %v668_v27, %v668_v27  ;;  %v680_v33 = vpack.c.bf16 %v672_v28, %v672_v28  ;;  %v1765_v27 = vld [vmem:[#allocation5 + $0x1b0] sm:$0xff]   ;;  %p1813_p2 = scmp.ne.s32.totalorder %s1370_s15, %s1812_s6  ;;  %p1818_p4 = scmp.lt.s32.totalorder %s1812_s6, %s1812_s6 }
 0x28d   :  { %1234 = vmatprep.mubr.bf16.mxu0 %v676_v29  ;;  %v1766_v29 = vld [vmem:[#allocation5 + $0x1f8] sm:$0xff]   ;;  %p1819_p5 = por %p1818_p4, %p1817_p3 }
 0x28e   :  { %1235 = vmatmul.mubr.bf16.vlgmr.msra.gmra.mrb[8].mxu0 %v675_v31 }
 0x28f   :  { %1558 = vmatpush3.bf16.msra.mxu0 %v1731_v30  ;;  %1314 = vmatprep.mubr.bf16.mxu0 %v680_v33  ;;  %v1767_v30 = vld [vmem:[#allocation5 + $0x1b8] sm:$0xff]   ;;  %p1820_p6 = pnand %p1819_p5, %p1813_p2 }
 0x290   :  { %1559 = vmatprep.subr.bf16.mxu0 %v1734_v32 }
 0x293   :  { %1560 = vmatpush3.bf16.msra.mxu0 %v1735_v35 }
 0x294   :  { %1561 = vmatprep.subr.bf16.mxu0 %v1738_v37 }
 0x295   :  { %v578_v43 = vpop.f32.mrb[4].mxu1 }
 0x296   :  { %v579_v44 = vadd.f32 %v578_v43, %v310_v38  ;;  %v580_v45 = vpop.f32.mrb[5].mxu1 }
 0x297   :  { %v581_v46 = vadd.f32 %v580_v45, %v314_v39  ;;  %v582_v47 = vpop.f32.mrb[6].mxu1  ;;  %1562 = vmatpush3.bf16.msra.mxu0 %v1739_v40 }
 0x298   :  { %v669_v52 = vmax.f32 %v579_v44, 0.0  ;;  %v583_v53 = vpop.f32.mrb[7].mxu1  ;;  %1563 = vmatprep.subr.bf16.mxu0 %v1742_v41 }
 0x299   :  { %v670_v1 = vmax.f32 %v581_v46, 0.0 }
 0x29a   :  { %v677_v59 = vpack.c.bf16 %v669_v52, %v669_v52 }
 0x29b   :  { %v678_v55 = vpack.c.bf16 %v670_v1, %v670_v1  ;;  %1564 = vmatpush3.bf16.msra.mxu0 %v1743_v50 }
 0x29c   :  { %1565 = vmatprep.subr.bf16.mxu0 %v1745_v54 }
 0x29d   :  { %1274 = vmatprep.mubr.bf16.mxu1 %v678_v55 }
 0x29e   :  { %1275 = vmatmul.mubr.bf16.vlgmr.msra.gmra.mrb[12].mxu1 %v677_v59 }
 0x29f   :  { %1580 = vmatpush3.bf16.msra.mxu1 %v1746_v56  ;;  %1566 = vmatpush3.bf16.msra.mxu0 %v1747_v57 }
 0x2a0   :  { %1581 = vmatprep.subr.bf16.mxu1 %v1748_v62  ;;  %1567 = vmatprep.subr.bf16.mxu0 %v1749_v0 }
 0x2a3   :  { %1582 = vmatpush3.bf16.msra.mxu1 %v1750_v42  ;;  %1568 = vmatpush3.bf16.msra.mxu0 %v1751_v2 }
 0x2a4   :  { %1583 = vmatprep.subr.bf16.mxu1 %v1752_v48  ;;  %1569 = vmatprep.subr.bf16.mxu0 %v1753_v49 }
 0x2a5   :  { %v660_v11 = vpop.f32.mrb[8].mxu1 }
 0x2a6   :  { %v662_v60 = vpop.f32.mrb[9].mxu1  ;;  %v661_v28 = vadd.f32 %v660_v11, %v326_v25 }
 0x2a7   :  { %v663_v61 = vadd.f32 %v662_v60, %v330_v51  ;;  %1584 = vmatpush3.bf16.msra.mxu1 %v1754_v5  ;;  %v664_v13 = vpop.f32.mrb[10].mxu1  ;;  %1570 = vmatpush3.bf16.msra.mxu0 %v1755_v6 }
 0x2a8   :  { %v665_v17 = vpop.f32.mrb[11].mxu1  ;;  %1585 = vmatprep.subr.bf16.mxu1 %v1756_v8  ;;  %1571 = vmatprep.subr.bf16.mxu0 %v1757_v9  ;;  %v673_v31 = vmax.f32 %v661_v28, 0.0 }
 0x2a9   :  { %v674_v19 = vmax.f32 %v663_v61, 0.0 }
 0x2aa   :  { %v681_v10 = vpack.c.bf16 %v673_v31, %v673_v31 }
 0x2ab   :  { %v682_v20 = vpack.c.bf16 %v674_v19, %v674_v19  ;;  %1586 = vmatpush3.bf16.msra.mxu1 %v1758_v14  ;;  %1572 = vmatpush3.bf16.msra.mxu0 %v1759_v15 }
 0x2ac   :  { %1587 = vmatprep.subr.bf16.mxu1 %v1760_v18 }
 0x2ad   :  { %1354 = vmatprep.mubr.bf16.mxu1 %v682_v20 }
 0x2ae   :  { %1315 = vmatmul.mubr.bf16.vlgmr.msra.gmra.mrb[12].mxu0 %v679_v21 }
 0x2af   :  { %1588 = vmatpush3.bf16.msra.mxu1 %v1761_v63 }
 0x2b0   :  { %1589 = vmatprep.subr.bf16.mxu1 %v1762_v23 }
 0x2b3   :  { %1590 = vmatpush3.bf16.msra.mxu1 %v1763_v24 }
 0x2b4   :  { %1591 = vmatprep.subr.bf16.mxu1 %v1764_v26 }
 0x2b7   :  { %1592 = vmatpush3.bf16.msra.mxu1 %v1765_v27 }
 0x2b8   :  { %1593 = vmatprep.subr.bf16.mxu1 %v1766_v29 }
 0x2bb   :  { %1594 = vmatpush3.bf16.msra.mxu1 %v1767_v30 }
 0x2be   :  { %1355 = vmatmul.mubr.bf16.vlgmr.msra.gmra.mrb[16].mxu1 %v681_v10 }
 0x361   :  { %v1529_v32 = vpop.f32.mrb[8].mxu0 }
 0x362   :  { %v1530_v33 = vpop.f32.mrb[9].mxu0 }
 0x363   :  { %v1531_v34 = vadd.f32 %v1530_v33, %v1529_v32  ;;  %v1532_v35 = vpop.f32.mrb[10].mxu0 }
 0x364   :  { %v1533_v36 = vpop.f32.mrb[11].mxu0 }
 0x365   :  { %v1237_v39 = vadd.f32 %v1531_v34, %v1431_v12 }
 0x371   :  { %v1551_v37 = vpop.f32.mrb[12].mxu1 }
 0x372   :  { %v1552_v38 = vpop.f32.mrb[13].mxu1 }
 0x373   :  { %v1553_v40 = vadd.f32 %v1552_v38, %v1551_v37  ;;  %v1554_v41 = vpop.f32.mrb[14].mxu1 }
 0x374   :  { %v1555_v43 = vpop.f32.mrb[15].mxu1 }
 0x375   :  { %v1277_v44 = vadd.f32 %v1553_v40, %v1237_v39 }
 0x381   :  { %v1573_v45 = vpop.f32.mrb[12].mxu0 }
 0x382   :  { %v1574_v46 = vpop.f32.mrb[13].mxu0 }
 0x383   :  { %v1575_v47 = vadd.f32 %v1574_v46, %v1573_v45  ;;  %v1576_v50 = vpop.f32.mrb[14].mxu0 }
 0x384   :  { %v1577_v52 = vpop.f32.mrb[15].mxu0 }
 0x385   :  { %v1317_v53 = vadd.f32 %v1575_v47, %v1277_v44 }
 0x391   :  { %v1595_v54 = vpop.f32.mrb[16].mxu1 }
 0x392   :  { %v1596_v1 = vpop.f32.mrb[17].mxu1 }
 0x393   :  { %v1597_v55 = vadd.f32 %v1596_v1, %v1595_v54  ;;  %v1598_v56 = vpop.f32.mrb[18].mxu1 }
 0x394   :  { %v1599_v57 = vpop.f32.mrb[19].mxu1 }
 0x395   :  { %v1357_v58 = vadd.f32 %v1597_v55, %v1317_v53 }
 0x397   :  { %1362 = vst [vmem:[#allocation7] sm:$0xff] %v1357_v58 }
 0x398   :  { %1823 = shalt.err (!%p1820_p6)
}
 0x399   :  { %s1824_s18 = scalar_lea.hbm %s2123_s7, 128 }
 0x39a   :  { %p1825_p7 = scmp.ne.s32.totalorder %s2123_s7, %s1824_s18  ;;  %p1828_p8 = scmp.lt.u32.totalorder %s1824_s18, %s2123_s7 }
 0x39c   :  { %p1830_p9 = pnand %p1828_p8, %p1825_p7 }
 0x39e   :  { %1833 = shalt.err (!%p1830_p9)
}
 0x39f   :  { %1372 = dma.vmem_to_hbm [thread:$0]  %s1370_s15, 128, %s2123_s7, [#allocation4]  }
 0x3a0   :  { %1838 = dma.done.wait [#allocation4], 128  }
 0x3a1   :  { %1839 = vsyncadd [#allocation4], 4294967168 }
 0x3a2   :  { %1376 = vsyncpa [#allocation3], 1 }
 0x3a3   :  { %1377 = vsyncpa [#allocation6], 1 }
 0x3a4   :  { %1378 = vsyncpa [#allocation4], 1 }

</bundles_post_ra>
